<compile_context>
chip_gen: v7x
topology: tpu7x:2x2x1
jax: 0.10.0
libtpu: 0.0.40
codegen_flags: <defaults>
</compile_context>

<pallas_src>
import jax
import jax.numpy as jnp
from jax.experimental import pallas as pl
from jax.experimental.pallas import tpu as pltpu

BN_EPS = 1e-5
LANE = 128


def proj_head_kernel(x_ref, w_ref, gamma_ref, beta_ref, o_ref):
    # ---- Linear: y = x @ W  (MXU matmul, f32 accumulation).
    # Bias omitted: it cancels exactly under training-mode BatchNorm.
    y = jnp.dot(x_ref[...], w_ref[...], preferred_element_type=jnp.float32)

    # ---- BatchNorm1d (training mode: biased batch statistics over axis 0).
    # The full batch lives in this block, so per-feature stats are exact.
    n = y.shape[0]
    inv_n = 1.0 / n
    mean = jnp.sum(y, axis=0, keepdims=True) * inv_n
    diff = y - mean
    var = jnp.sum(diff * diff, axis=0, keepdims=True) * inv_n
    y_hat = diff * jax.lax.rsqrt(var + BN_EPS)
    y_bn = y_hat * gamma_ref[...] + beta_ref[...]

    # ---- ReLU ----
    o_ref[...] = jnp.maximum(y_bn, 0.0).astype(o_ref.dtype)


def _pad_last(a, target):
    pad = target - a.shape[-1]
    if pad == 0:
        return a
    widths = [(0, 0)] * (a.ndim - 1) + [(0, pad)]
    return jnp.pad(a, widths)


def _pick_tile(d_out_p):
    # Largest lane-dense tile that divides the padded feature extent.
    for t in (512, 256, 128):
        if d_out_p % t == 0:
            return t
    return LANE  # unreachable: d_out_p is a multiple of 128


def proj_head_forward(x, w, gamma, beta):
    """x: [N, D_in] f32, w: [D_in, D_out] (pre-transposed), gamma/beta: [D_out]."""
    n, d_in = x.shape
    d_out = w.shape[1]

    # Pad feature axis to a multiple of 128 so output stores are unmasked (lane-dense).
    d_out_p = pl.cdiv(d_out, LANE) * LANE
    tile = _pick_tile(d_out_p)

    w_p = _pad_last(w, d_out_p)
    gamma_p = _pad_last(gamma.reshape(1, d_out), d_out_p)
    beta_p = _pad_last(beta.reshape(1, d_out), d_out_p)

    grid = (d_out_p // tile,)

    out_p = pl.pallas_call(
        proj_head_kernel,
        out_shape=jax.ShapeDtypeStruct((n, d_out_p), jnp.float32),
        grid_spec=pltpu.PrefetchScalarGridSpec(
            num_scalar_prefetch=0,
            grid=grid,
            in_specs=[
                # x: same block every step -> Pallas keeps it resident (no re-DMA).
                pl.BlockSpec((n, d_in), lambda j: (0, 0)),
                # W columns: one lane-dense slab per grid step.
                pl.BlockSpec((d_in, tile), lambda j: (0, j)),
                # gamma / beta: only the slab needed by this tile.
                pl.BlockSpec((1, tile), lambda j: (0, j)),
                pl.BlockSpec((1, tile), lambda j: (0, j)),
            ],
            out_specs=pl.BlockSpec((n, tile), lambda j: (0, j)),
        ),
        compiler_params=pltpu.CompilerParams(
            dimension_semantics=("parallel",),   # feature tiles are independent
            vmem_limit_bytes=32 * 1024 * 1024,   # fits v7x's 64 MiB as well as v5e/v6e
        ),
    )(x, w_p, gamma_p, beta_p)

    # Drop the zero-padded feature columns.
    return out_p[:, :d_out]


if __name__ == "__main__":
    # Small shapes consistent with a 2-D Linear + BatchNorm1d forward.
    N, D_IN, D_OUT = 8, 32, 16

    key = jax.random.PRNGKey(0)
    kx, kw, kb = jax.random.split(key, 3)

    x = jax.random.normal(kx, (N, D_IN), dtype=jnp.float32)

    # Deterministic parameter init (PyTorch-Linear-style uniform bounds).
    bound = 1.0 / jnp.sqrt(D_IN)
    w = jax.random.uniform(kw, (D_IN, D_OUT), minval=-bound, maxval=bound,
                           dtype=jnp.float32)          # l1.weight (transposed to [D_in, D_out])
    b = jax.random.uniform(kb, (D_OUT,), minval=-bound, maxval=bound,
                           dtype=jnp.float32)          # l1.bias (cancels under BN; not fed to kernel)
    gamma = jnp.ones((D_OUT,), dtype=jnp.float32)      # bn1.weight (default init)
    beta = jnp.zeros((D_OUT,), dtype=jnp.float32)      # bn1.bias  (default init)
    # NOTE: self.l2 exists in the module but is unused in forward; no compute needed.

    out = proj_head_forward(x, w, gamma, beta)
    jax.block_until_ready(out)

    # Pure-JAX reference (Linear WITH bias -> training-mode BN -> ReLU), matching the
    # PyTorch module.  The kernel omits the bias because it cancels exactly.
    y_ref = x @ w + b
    mu = jnp.mean(y_ref, axis=0, keepdims=True)
    var = jnp.mean((y_ref - mu) ** 2, axis=0, keepdims=True)
    y_ref = (y_ref - mu) / jnp.sqrt(var + BN_EPS) * gamma + beta
    y_ref = jnp.maximum(y_ref, 0.0)
    assert out.shape == (N, D_OUT)
    assert jnp.allclose(out, y_ref, atol=1e-5, rtol=1e-5), "mismatch vs reference"

    print("KERNEL_OK")
</pallas_src>

<mosaic_0001>
module attributes {stable_mosaic.version = 11 : i64} {
  func.func @proj_head_kernel(%arg0: i32, %arg1: memref<8x32xf32, #tpu.memory_space<vmem>>, %arg2: memref<32x128xf32, #tpu.memory_space<vmem>>, %arg3: memref<1x128xf32, #tpu.memory_space<vmem>>, %arg4: memref<1x128xf32, #tpu.memory_space<vmem>>, %arg5: memref<8x128xf32, #tpu.memory_space<vmem>>) attributes {dimension_semantics = [#tpu.dimension_semantics<parallel>], iteration_bounds = array<i64: 1>, scalar_prefetch = 0 : i64, scratch_operands = 0 : i64, tpu.core_type = #tpu.core_type<tc>, window_params = [{pipeline_mode = #tpu.pipeline_mode<synchronous>, transform_indices = @transform_0, window_bounds = array<i64: 8, 32>}, {transform_indices = @transform_1, window_bounds = array<i64: 32, 128>}, {transform_indices = @transform_2, window_bounds = array<i64: 1, 128>}, {transform_indices = @transform_3, window_bounds = array<i64: 1, 128>}, {transform_indices = @transform_4, window_bounds = array<i64: 8, 128>}]} {
    %c0 = arith.constant 0 : index
    %c0_0 = arith.constant 0 : index
    %0 = vector.load %arg1[%c0, %c0_0] : memref<8x32xf32, #tpu.memory_space<vmem>>, vector<8x32xf32>
    %c0_1 = arith.constant 0 : index
    %c0_2 = arith.constant 0 : index
    %1 = vector.load %arg2[%c0_1, %c0_2] : memref<32x128xf32, #tpu.memory_space<vmem>>, vector<32x128xf32>
    %cst = arith.constant dense<0.000000e+00> : vector<8x128xf32>
    %2 = tpu.matmul %0, %1, %cst {dimension_numbers = #tpu.dot_dimension_numbers<[1], [0], [0], [1], [0, 0, 1, 1], [], []>} : vector<8x32xf32>, vector<32x128xf32>, vector<8x128xf32> -> vector<8x128xf32>
    %cst_3 = arith.constant dense<0.000000e+00> : vector<128xf32>
    %3 = vector.multi_reduction <add>, %2, %cst_3 [0] : vector<8x128xf32> to vector<128xf32>
    %4 = vector.shape_cast %3 : vector<128xf32> to vector<1x128xf32>
    %cst_4 = arith.constant 1.250000e-01 : f32
    %5 = vector.broadcast %cst_4 : f32 to vector<1x128xf32>
    %6 = arith.mulf %4, %5 : vector<1x128xf32>
    %7 = vector.broadcast %6 : vector<1x128xf32> to vector<8x128xf32>
    %8 = arith.subf %2, %7 : vector<8x128xf32>
    %9 = arith.mulf %8, %8 : vector<8x128xf32>
    %cst_5 = arith.constant dense<0.000000e+00> : vector<128xf32>
    %10 = vector.multi_reduction <add>, %9, %cst_5 [0] : vector<8x128xf32> to vector<128xf32>
    %11 = vector.shape_cast %10 : vector<128xf32> to vector<1x128xf32>
    %cst_6 = arith.constant 1.250000e-01 : f32
    %12 = vector.broadcast %cst_6 : f32 to vector<1x128xf32>
    %13 = arith.mulf %11, %12 : vector<1x128xf32>
    %cst_7 = arith.constant 9.99999974E-6 : f32
    %14 = vector.broadcast %cst_7 : f32 to vector<1x128xf32>
    %15 = arith.addf %13, %14 : vector<1x128xf32>
    %16 = math.rsqrt %15 : vector<1x128xf32>
    %17 = vector.broadcast %16 : vector<1x128xf32> to vector<8x128xf32>
    %18 = arith.mulf %8, %17 : vector<8x128xf32>
    %c0_8 = arith.constant 0 : index
    %c0_9 = arith.constant 0 : index
    %19 = vector.load %arg3[%c0_8, %c0_9] : memref<1x128xf32, #tpu.memory_space<vmem>>, vector<1x128xf32>
    %20 = vector.broadcast %19 : vector<1x128xf32> to vector<8x128xf32>
    %21 = arith.mulf %18, %20 : vector<8x128xf32>
    %c0_10 = arith.constant 0 : index
    %c0_11 = arith.constant 0 : index
    %22 = vector.load %arg4[%c0_10, %c0_11] : memref<1x128xf32, #tpu.memory_space<vmem>>, vector<1x128xf32>
    %23 = vector.broadcast %22 : vector<1x128xf32> to vector<8x128xf32>
    %24 = arith.addf %21, %23 : vector<8x128xf32>
    %cst_12 = arith.constant 0.000000e+00 : f32
    %25 = vector.broadcast %cst_12 : f32 to vector<8x128xf32>
    %26 = arith.maximumf %24, %25 : vector<8x128xf32>
    %c0_13 = arith.constant 0 : index
    %c0_14 = arith.constant 0 : index
    %27 = vector.load %arg5[%c0_13, %c0_14] : memref<8x128xf32, #tpu.memory_space<vmem>>, vector<8x128xf32>
    tpu.vector_store %arg5[%c0_13, %c0_14], %26 {strides = array<i32>} : memref<8x128xf32, #tpu.memory_space<vmem>>, vector<8x128xf32>,
    return
  }
  func.func @transform_0(%arg0: i32) -> (i32, i32) {
    %c0_i32 = arith.constant 0 : i32
    %c0_i32_0 = arith.constant 0 : i32
    %c0_i32_1 = arith.constant 0 : i32
    return %c0_i32, %c0_i32_0 : i32, i32
  }
  func.func @transform_1(%arg0: i32) -> (i32, i32) {
    %c0_i32 = arith.constant 0 : i32
    %c0_i32_0 = arith.constant 0 : i32
    return %c0_i32, %arg0 : i32, i32
  }
  func.func @transform_2(%arg0: i32) -> (i32, i32) {
    %c0_i32 = arith.constant 0 : i32
    %c0_i32_0 = arith.constant 0 : i32
    return %c0_i32, %arg0 : i32, i32
  }
  func.func @transform_3(%arg0: i32) -> (i32, i32) {
    %c0_i32 = arith.constant 0 : i32
    %c0_i32_0 = arith.constant 0 : i32
    return %c0_i32, %arg0 : i32, i32
  }
  func.func @transform_4(%arg0: i32) -> (i32, i32) {
    %c0_i32 = arith.constant 0 : i32
    %c0_i32_0 = arith.constant 0 : i32
    return %c0_i32, %arg0 : i32, i32
  }
}

</mosaic_0001>

<bundles_post_ra>
// kernel: tpu_custom_call.1
= control target key start
LH: loop header
LB: loop body
LE: loop exit
PB: predicated region body
PF: predicated region fallthrough
CT: control target
= control target key end

     0   :  { %9 = vsyncpa [#allocation3], 0  ;;  %s365_s0 = inlined_call_operand.hbm [shape: f32[8,32], index: 0, kind: input, shape index: {}]   ;;  %s366_s1 = inlined_call_operand.hbm [shape: f32[32,128], index: 1, kind: input, shape index: {}]   ;;  %s367_s2 = inlined_call_operand.vmem [shape: f32[1,128], index: 2, kind: input, shape index: {}]   ;;  %s368_s3 = inlined_call_operand.vmem [shape: f32[1,128], index: 3, kind: input, shape index: {}]   ;;  %s369_s4 = inlined_call_operand.hbm [shape: f32[8,128], index: 4, kind: output, shape index: {}]  }
   0x1   :  { %10 = vsyncpa [#allocation6], 0 }
   0x2   :  { %11 = vsyncpa [#allocation4], 0  ;;  %s283_s15 = smov [#allocation2]   ;;  %s284_s17 = smov [#allocation5]  }
   0x3   :  { %s18_s16 = sshll.u32 %s283_s15, 4  ;;  %s27_s18 = sshll.u32 %s284_s17, 4  ;;  %s19_s16 = int_to_ptr.vmem [resolvable:$true] %s18_s16  ;;  %s316_s18 = int_to_ptr.vmem [resolvable:$true] %s27_s18 }
   0x4   :  { %s211_s21 = scalar_lea.hbm %s365_s0, 128 }
   0x5   :  { %p212_p0 = scmp.ne.s32.totalorder %s365_s0, %s211_s21  ;;  %p215_p1 = scmp.lt.u32.totalorder %s211_s21, %s365_s0 }
   0x7   :  { %p217_p2 = pnand %p215_p1, %p212_p0 }
   0x9   :  { %220 = shalt.err (!%p217_p2)
}
   0xa   :  { %s221_s26 = scalar_lea.vmem %s19_s16, 128  ;;  %p226_p4 = scmp.lt.s32.totalorder %s19_s16, %s19_s16 }
   0xb   :  { %p222_p3 = scmp.ne.s32.totalorder %s19_s16, %s221_s26  ;;  %p227_p5 = scmp.lt.s32.totalorder %s221_s26, %s221_s26 }
   0xd   :  { %p228_p6 = por %p227_p5, %p226_p4 }
   0xf   :  { %p229_p7 = pnand %p228_p6, %p222_p3 }
  0x11   :  { %232 = shalt.err (!%p229_p7)
}
  0x12   :  { %21 = dma.hbm_to_vmem [thread:$0]  %s365_s0, 128, %s19_s16, [#allocation3]  }
  0x13   :  { %s233_s5 = scalar_lea.hbm %s366_s1, 512 }
  0x14   :  { %p234_p8 = scmp.ne.s32.totalorder %s366_s1, %s233_s5  ;;  %p237_p9 = scmp.lt.u32.totalorder %s233_s5, %s366_s1 }
  0x16   :  { %p239_p10 = pnand %p237_p9, %p234_p8 }
  0x18   :  { %242 = shalt.err (!%p239_p10)
}
  0x19   :  { %s243_s10 = scalar_lea.vmem %s316_s18, 512  ;;  %p248_p12 = scmp.lt.s32.totalorder %s316_s18, %s316_s18 }
  0x1a   :  { %p244_p11 = scmp.ne.s32.totalorder %s316_s18, %s243_s10  ;;  %p249_p13 = scmp.lt.s32.totalorder %s243_s10, %s243_s10 }
  0x1c   :  { %p250_p0 = por %p249_p13, %p248_p12 }
  0x1e   :  { %p251_p1 = pnand %p250_p0, %p244_p11 }
  0x20   :  { %254 = shalt.err (!%p251_p1)
}
  0x21   :  { %s285_s0 = smov 128   ;;  %s286_s11 = smov 8  }
  0x22   :  { %33 = dma.hbm_to_vmem [thread:$0]  %s366_s1, 512, %s316_s18, [#allocation6], %s285_s0, %s285_s0, %s286_s11  }
  0x23   :  { %277 = dma.done.wait [#allocation3], 128  }
  0x24   :  { %278 = vsyncadd [#allocation3], 4294967168 }
  0x25   :  { %279 = dma.done.wait [#allocation6], 512  }
  0x26   :  { %280 = vsyncadd [#allocation6], 4294966784  ;;  %v287_v0 = vmov 0.0|0.0   ;;  %vm288_vm0 = vmmov 0   ;;  %v289_v1 = vmov 0.0   ;;  %v45_v2 = vld [vmem:[#allocation5] sm:$0xff] }
  0x27   :  { %195 = vmatprep.subr.bf16.mxu0 %v287_v0  ;;  %192 = vmatprep.mubr.msk.f32.mxu0 %vm288_vm0, %v289_v1  ;;  %v46_v3 = vld [vmem:[#allocation5 + $0x8] sm:$0xff]  ;;  %v47_v4 = vld [vmem:[#allocation5 + $0x10] sm:$0xff]  ;;  %v48_v6 = vld [vmem:[#allocation5 + $0x18] sm:$0xff]  ;;  %vm49_vm1 = vcmask 261120   ;;  %s290_s17 = smov [#allocation7]  }
  0x28   :  { %v196_v5 = vpack.c.bf16 %v46_v3, %v45_v2  ;;  %v199_v7 = vpack.c.bf16 %v48_v6, %v47_v4  ;;  %v44_v8 = vld [vmem:[#allocation2] sm:$0xff]  ;;  %s166_s18 = sshll.u32 %s290_s17, 4  ;;  %s167_s18 = int_to_ptr.vmem [resolvable:$true] %s166_s18 }
  0x29   :  { %v177_v29 = vld [vmem:[%s367_s2] ss:$0 sm:$0xff]  ;;  %s255_s19 = scalar_lea.vmem %s167_s18, 128  ;;  %p260_p3 = scmp.lt.s32.totalorder %s167_s18, %s167_s18 }
  0x2a   :  { %197 = vmatpush3.bf16.msra.mxu0 %v196_v5  ;;  %v178_v31 = vld [vmem:[%s368_s3] ss:$0 sm:$0xff]  ;;  %p256_p2 = scmp.ne.s32.totalorder %s167_s18, %s255_s19  ;;  %p261_p4 = scmp.lt.s32.totalorder %s255_s19, %s255_s19 }
  0x2b   :  { %198 = vmatprep.subr.bf16.mxu0 %v287_v0 }
  0x2c   :  { %p262_p5 = por %p261_p4, %p260_p3 }
  0x2e   :  { %200 = vmatpush3.bf16.msra.mxu0 %v199_v7  ;;  %p263_p6 = pnand %p262_p5, %p256_p2 }
  0x31   :  { %193 = vmatmul.mubr.msk.f32.vlgmr.msra.gmra.mrb[0].mxu0 %vm49_vm1, %v44_v8 }
 0x104   :  { %v119_v9 = vpop.f32.mrb[0].mxu0 }
 0x105   :  { %v123_v10 = vrot.slane %v119_v9, 4  ;;  %v194_v11 = vpop.f32.mrb[1].mxu0 }
 0x107   :  { %v124_v12 = vadd.f32 %v123_v10, %v119_v9 }
 0x109   :  { %v125_v13 = vrot.slane %v124_v12, 2 }
 0x10b   :  { %v126_v14 = vadd.f32 %v125_v13, %v124_v12 }
 0x10d   :  { %v127_v15 = vrot.slane %v126_v14, 1 }
 0x10f   :  { %v128_v16 = vadd.f32 %v127_v15, %v126_v14 }
 0x111   :  { %v129_v17 = vmul.f32 0.125, %v128_v16 }
 0x113   :  { %v130_v18 = vsub.f32 %v119_v9, %v129_v17 }
 0x115   :  { %v131_v19 = vmul.f32 %v130_v18, %v130_v18 }
 0x117   :  { %v132_v20 = vrot.slane %v131_v19, 4 }
 0x119   :  { %v133_v21 = vadd.f32 %v132_v20, %v131_v19 }
 0x11b   :  { %v134_v22 = vrot.slane %v133_v21, 2 }
 0x11d   :  { %v135_v23 = vadd.f32 %v134_v22, %v133_v21 }
 0x11f   :  { %v136_v24 = vrot.slane %v135_v23, 1 }
 0x121   :  { %v137_v25 = vadd.f32 %v136_v24, %v135_v23 }
 0x123   :  { %v138_v26 = vmul.f32 0.125, %v137_v25 }
 0x125   :  { %v139_v27 = vadd.f32 1e-05, %v138_v26 }
 0x127   :  { %209 = vrsqrt.f32 %v139_v27 }
 0x131   :  { %v210_v28 = vpop.eup %209 }
 0x132   :  { %v141_v30 = vmul.f32 %v210_v28, %v130_v18 }
 0x134   :  { %v149_v32 = vmul.f32 %v177_v29, %v141_v30 }
 0x136   :  { %v157_v33 = vadd.f32 %v178_v31, %v149_v32 }
 0x138   :  { %v158_v34 = vmax.f32 %v157_v33, 0.0 }
 0x13a   :  { %159 = vst [vmem:[#allocation7] sm:$0xff] %v158_v34 }
 0x13b   :  { %266 = shalt.err (!%p263_p6)
}
 0x13c   :  { %s267_s21 = scalar_lea.hbm %s369_s4, 128 }
 0x13d   :  { %p268_p7 = scmp.ne.s32.totalorder %s369_s4, %s267_s21  ;;  %p271_p8 = scmp.lt.u32.totalorder %s267_s21, %s369_s4 }
 0x13f   :  { %p273_p9 = pnand %p271_p8, %p268_p7 }
 0x141   :  { %276 = shalt.err (!%p273_p9)
}
 0x142   :  { %169 = dma.vmem_to_hbm [thread:$0]  %s167_s18, 128, %s369_s4, [#allocation4]  }
 0x143   :  { %281 = dma.done.wait [#allocation4], 128  }
 0x144   :  { %282 = vsyncadd [#allocation4], 4294967168 }
 0x145   :  { %173 = vsyncpa [#allocation3], 1 }
 0x146   :  { %174 = vsyncpa [#allocation6], 1 }
 0x147   :  { %175 = vsyncpa [#allocation4], 1 }

</bundles_post_ra>
